<compile_context>
chip_gen: v5e
topology: v5e:2x2
jax: 0.10.0
libtpu: 0.0.40
codegen_flags: <defaults>
</compile_context>

<pallas_src>
import functools

import jax
import jax.numpy as jnp
from jax.experimental import pallas as pl
from jax.experimental.pallas import tpu as pltpu

KERNEL_SIZE = 2   # nn.MaxPool2d(2, stride=6)
STRIDE = 6


def _round_up(x, m):
    return (x + m - 1) // m * m


def _maxpool_kernel(x_ref, o_ref, *, out_h, out_w):
    # x_ref: (bm, H, W) VMEM block (W on lanes, H on sublanes).
    # o_ref: (bm, out_h*out_w) lane-dense slab, or (bm, out_h, out_w) fallback.
    w = x_ref.shape[2]
    pieces = []
    for ho in range(out_h):
        # Vertical (sublane) max of the only two rows this output row uses.
        r0 = x_ref[:, ho * STRIDE, :]
        r1 = x_ref[:, ho * STRIDE + 1, :]
        rowmax = jnp.maximum(r0, r1)                              # (bm, W)
        # Horizontal (lane) max of adjacent columns: one shifted slab per row.
        cmax = jnp.maximum(rowmax[:, : w - 1], rowmax[:, 1:])     # (bm, W-1)
        for wo in range(out_w):
            pieces.append(cmax[:, wo * STRIDE: wo * STRIDE + 1])  # (bm, 1)
    out = jnp.concatenate(pieces, axis=-1)                        # (bm, out_h*out_w)
    o_ref[...] = out.reshape(o_ref.shape)


class PrRoIPool2D:
    """JAX/Pallas port of the (degenerate) PrRoIPool2D module.

    NOTE: the reference forward never uses rois / pooled_height /
    pooled_width / spatial_scale -- it is literally MaxPool2d(2, stride=6).
    """

    def __init__(self, pooled_height, pooled_width, spatial_scale):
        self.pooled_height = int(pooled_height)
        self.pooled_width = int(pooled_width)
        self.spatial_scale = float(spatial_scale)
        # TODO(synk): true PrRoIPool (per-ROI bilinear integral pooling) is NOT
        # implemented because the reference forward never computes it.

    def __call__(self, features, rois):
        # features: (N, C, H, W) float (PyTorch NCHW convention)
        # rois:     ignored by the reference forward pass.
        del rois
        n, c, h, w = features.shape
        out_h = (h - KERNEL_SIZE) // STRIDE + 1
        out_w = (w - KERNEL_SIZE) // STRIDE + 1
        if out_h <= 0 or out_w <= 0:
            return jnp.zeros((n, c, max(out_h, 0), max(out_w, 0)), features.dtype)

        nc = n * c
        out_hw = out_h * out_w
        x = features.reshape(nc, h, w)    # NCHW-native: free reshape, no transpose

        # ---- VMEM-aware block sizing using padded (tiled) footprints ----
        itemsize = jnp.dtype(features.dtype).itemsize
        sub = max(8, 32 // itemsize)      # sublane tile: f32 -> 8, bf16 -> 16, int8 -> 32
        padded_slice = _round_up(h, sub) * _round_up(w, 128) * itemsize
        budget_bytes = 4 * 1024 * 1024    # per input block (v5e-safe when double buffered)
        bm_budget = max(1, budget_bytes // padded_slice)

        if nc <= 8:
            bm = nc                       # block spans the full N*C axis
            lane_dense = True
        elif bm_budget >= 8:
            # Multiple-of-8 blocks (sublane-aligned 2-D output block); cap at
            # ceil(nc/2) so the parallel axis has >=2 steps (both v7x TCs busy).
            bm = min(bm_budget, pl.cdiv(nc, 2))
            bm = max(8, (bm // 8) * 8)
            lane_dense = True
        else:
            # Very large single (H, W) slices: drop the lane-dense 2-D output
            # layout so bm may be < 8.
            bm = max(1, min(bm_budget, nc))
            lane_dense = False
            # TODO(synk): tile H in multiples of lcm(STRIDE, 8) for feature maps
            # whose single (H, W) slice exceeds the VMEM budget.

        grid = (pl.cdiv(nc, bm),)

        in_block_bytes = bm * padded_slice
        if lane_dense:
            out_shape = jax.ShapeDtypeStruct((nc, out_hw), features.dtype)
            out_spec = pl.BlockSpec((bm, out_hw), lambda i: (i, 0))
            out_block_bytes = _round_up(bm, sub) * _round_up(out_hw, 128) * itemsize
        else:
            out_shape = jax.ShapeDtypeStruct((nc, out_h, out_w), features.dtype)
            out_spec = pl.BlockSpec((bm, out_h, out_w), lambda i: (i, 0, 0))
            out_block_bytes = bm * _round_up(out_h, sub) * _round_up(out_w, 128) * itemsize

        # Double-buffered input + output blocks, plus headroom; matching limit.
        vmem_need = 2 * (in_block_bytes + out_block_bytes)
        vmem_limit = int(min(max(vmem_need + (4 << 20), 16 << 20), 64 << 20))

        kernel = functools.partial(_maxpool_kernel, out_h=out_h, out_w=out_w)
        out = pl.pallas_call(
            kernel,
            out_shape=out_shape,
            grid=grid,
            in_specs=[pl.BlockSpec((bm, h, w), lambda i: (i, 0, 0))],
            out_specs=out_spec,
            compiler_params=pltpu.CompilerParams(
                dimension_semantics=("parallel",),
                vmem_limit_bytes=vmem_limit),
        )(x)

        return out.reshape(n, c, out_h, out_w)


if __name__ == "__main__":
    key = jax.random.PRNGKey(0)
    k1, k2 = jax.random.split(key)

    # Small shapes consistent with the module: batch=2, channels=4, 16x16 map.
    features = jax.random.normal(k1, (2, 4, 16, 16), dtype=jnp.float32)
    # rois in (batch_idx, x0, y0, x1, y1) format — unused by the forward pass.
    rois = jnp.concatenate(
        [jnp.zeros((3, 1), jnp.float32),
         jax.random.uniform(k2, (3, 4), dtype=jnp.float32) * 15.0],
        axis=1)

    pool = PrRoIPool2D(pooled_height=7, pooled_width=7, spatial_scale=1.0)
    out = jax.block_until_ready(pool(features, rois))

    # Reference: MaxPool2d(kernel=2, stride=6) via lax.reduce_window.
    ref = jax.lax.reduce_window(
        features, -jnp.inf, jax.lax.max,
        window_dimensions=(1, 1, KERNEL_SIZE, KERNEL_SIZE),
        window_strides=(1, 1, STRIDE, STRIDE),
        padding="VALID")

    assert out.shape == ref.shape == (2, 4, 3, 3), (out.shape, ref.shape)
    assert jnp.allclose(out, ref), "mismatch vs reference max-pool"
    print("KERNEL_OK")
</pallas_src>

<mosaic_0001>
module attributes {stable_mosaic.version = 11 : i64} {
  func.func @_maxpool_kernel(%arg0: i32, %arg1: memref<8x16x16xf32, #tpu.memory_space<vmem>>, %arg2: memref<8x9xf32, #tpu.memory_space<vmem>>) attributes {dimension_semantics = [#tpu.dimension_semantics<parallel>], iteration_bounds = array<i64: 1>, scalar_prefetch = 0 : i64, scratch_operands = 0 : i64, tpu.core_type = #tpu.core_type<tc>, window_params = [{transform_indices = @transform_0, window_bounds = array<i64: 8, 16, 16>}, {transform_indices = @transform_1, window_bounds = array<i64: 8, 9>}]} {
    %c0 = arith.constant 0 : index
    %c0_0 = arith.constant 0 : index
    %c0_1 = arith.constant 0 : index
    %0 = vector.load %arg1[%c0, %c0_0, %c0_1] : memref<8x16x16xf32, #tpu.memory_space<vmem>>, vector<8x1x16xf32>
    %1 = vector.shape_cast %0 : vector<8x1x16xf32> to vector<8x16xf32>
    %c0_2 = arith.constant 0 : index
    %c1 = arith.constant 1 : index
    %c0_3 = arith.constant 0 : index
    %2 = vector.load %arg1[%c0_2, %c1, %c0_3] : memref<8x16x16xf32, #tpu.memory_space<vmem>>, vector<8x1x16xf32>
    %3 = vector.shape_cast %2 : vector<8x1x16xf32> to vector<8x16xf32>
    %4 = arith.maximumf %1, %3 : vector<8x16xf32>
    %5 = vector.extract_strided_slice %4 {offsets = [0, 0], sizes = [8, 15], strides = [1, 1]} : vector<8x16xf32> to vector<8x15xf32>
    %6 = vector.extract_strided_slice %4 {offsets = [0, 1], sizes = [8, 15], strides = [1, 1]} : vector<8x16xf32> to vector<8x15xf32>
    %7 = arith.maximumf %5, %6 : vector<8x15xf32>
    %8 = vector.extract_strided_slice %7 {offsets = [0, 0], sizes = [8, 1], strides = [1, 1]} : vector<8x15xf32> to vector<8x1xf32>
    %9 = vector.extract_strided_slice %7 {offsets = [0, 6], sizes = [8, 1], strides = [1, 1]} : vector<8x15xf32> to vector<8x1xf32>
    %10 = vector.extract_strided_slice %7 {offsets = [0, 12], sizes = [8, 1], strides = [1, 1]} : vector<8x15xf32> to vector<8x1xf32>
    %c0_4 = arith.constant 0 : index
    %c6 = arith.constant 6 : index
    %c0_5 = arith.constant 0 : index
    %11 = vector.load %arg1[%c0_4, %c6, %c0_5] : memref<8x16x16xf32, #tpu.memory_space<vmem>>, vector<8x1x16xf32>
    %12 = vector.shape_cast %11 : vector<8x1x16xf32> to vector<8x16xf32>
    %c0_6 = arith.constant 0 : index
    %c7 = arith.constant 7 : index
    %c0_7 = arith.constant 0 : index
    %13 = vector.load %arg1[%c0_6, %c7, %c0_7] : memref<8x16x16xf32, #tpu.memory_space<vmem>>, vector<8x1x16xf32>
    %14 = vector.shape_cast %13 : vector<8x1x16xf32> to vector<8x16xf32>
    %15 = arith.maximumf %12, %14 : vector<8x16xf32>
    %16 = vector.extract_strided_slice %15 {offsets = [0, 0], sizes = [8, 15], strides = [1, 1]} : vector<8x16xf32> to vector<8x15xf32>
    %17 = vector.extract_strided_slice %15 {offsets = [0, 1], sizes = [8, 15], strides = [1, 1]} : vector<8x16xf32> to vector<8x15xf32>
    %18 = arith.maximumf %16, %17 : vector<8x15xf32>
    %19 = vector.extract_strided_slice %18 {offsets = [0, 0], sizes = [8, 1], strides = [1, 1]} : vector<8x15xf32> to vector<8x1xf32>
    %20 = vector.extract_strided_slice %18 {offsets = [0, 6], sizes = [8, 1], strides = [1, 1]} : vector<8x15xf32> to vector<8x1xf32>
    %21 = vector.extract_strided_slice %18 {offsets = [0, 12], sizes = [8, 1], strides = [1, 1]} : vector<8x15xf32> to vector<8x1xf32>
    %c0_8 = arith.constant 0 : index
    %c12 = arith.constant 12 : index
    %c0_9 = arith.constant 0 : index
    %22 = vector.load %arg1[%c0_8, %c12, %c0_9] : memref<8x16x16xf32, #tpu.memory_space<vmem>>, vector<8x1x16xf32>
    %23 = vector.shape_cast %22 : vector<8x1x16xf32> to vector<8x16xf32>
    %c0_10 = arith.constant 0 : index
    %c13 = arith.constant 13 : index
    %c0_11 = arith.constant 0 : index
    %24 = vector.load %arg1[%c0_10, %c13, %c0_11] : memref<8x16x16xf32, #tpu.memory_space<vmem>>, vector<8x1x16xf32>
    %25 = vector.shape_cast %24 : vector<8x1x16xf32> to vector<8x16xf32>
    %26 = arith.maximumf %23, %25 : vector<8x16xf32>
    %27 = vector.extract_strided_slice %26 {offsets = [0, 0], sizes = [8, 15], strides = [1, 1]} : vector<8x16xf32> to vector<8x15xf32>
    %28 = vector.extract_strided_slice %26 {offsets = [0, 1], sizes = [8, 15], strides = [1, 1]} : vector<8x16xf32> to vector<8x15xf32>
    %29 = arith.maximumf %27, %28 : vector<8x15xf32>
    %30 = vector.extract_strided_slice %29 {offsets = [0, 0], sizes = [8, 1], strides = [1, 1]} : vector<8x15xf32> to vector<8x1xf32>
    %31 = vector.extract_strided_slice %29 {offsets = [0, 6], sizes = [8, 1], strides = [1, 1]} : vector<8x15xf32> to vector<8x1xf32>
    %32 = vector.extract_strided_slice %29 {offsets = [0, 12], sizes = [8, 1], strides = [1, 1]} : vector<8x15xf32> to vector<8x1xf32>
    %33 = tpu.concatenate %8, %9, %10, %19, %20, %21, %30, %31, %32 in 1 : vector<8x1xf32>, vector<8x1xf32>, vector<8x1xf32>, vector<8x1xf32>, vector<8x1xf32>, vector<8x1xf32>, vector<8x1xf32>, vector<8x1xf32>, vector<8x1xf32> -> vector<8x9xf32>
    %c0_12 = arith.constant 0 : index
    %c0_13 = arith.constant 0 : index
    %34 = vector.load %arg2[%c0_12, %c0_13] : memref<8x9xf32, #tpu.memory_space<vmem>>, vector<8x9xf32>
    tpu.vector_store %arg2[%c0_12, %c0_13], %33 {strides = array<i32>} : memref<8x9xf32, #tpu.memory_space<vmem>>, vector<8x9xf32>,
    return
  }
  func.func @transform_0(%arg0: i32) -> (i32, i32, i32) {
    %c0_i32 = arith.constant 0 : i32
    %c0_i32_0 = arith.constant 0 : i32
    %c0_i32_1 = arith.constant 0 : i32
    return %arg0, %c0_i32, %c0_i32_0 : i32, i32, i32
  }
  func.func @transform_1(%arg0: i32) -> (i32, i32) {
    %c0_i32 = arith.constant 0 : i32
    %c0_i32_0 = arith.constant 0 : i32
    return %arg0, %c0_i32 : i32, i32
  }
}

</mosaic_0001>

<bundles_post_ra>
// kernel: tpu_custom_call.1
= control target key start
LH: loop header
LB: loop body
LE: loop exit
PB: predicated region body
PF: predicated region fallthrough
CT: control target
= control target key end

     0   :  { %6 = vsyncpa [#allocation3], 0  ;;  %s590_s0 = inlined_call_operand.hbm [shape: f32[8,16,16], index: 0, kind: input, shape index: {}]   ;;  %s591_s1 = inlined_call_operand.hbm [shape: f32[8,9], index: 1, kind: output, shape index: {}]  }
   0x1   :  { %7 = vsyncpa [#allocation4], 0  ;;  %s12_s8 = sshll.u32 %s590_s0, 4  ;;  %s415_s9 = smov [#allocation2]   ;;  %s13_s8 = int_to_ptr.hbm [resolvable:$true] %s12_s8 }
   0x2   :  { %s14_s10 = sshll.u32 %s415_s9, 4  ;;  %s416_s11 = smov 128   ;;  %s15_s10 = int_to_ptr.vmem [resolvable:$true] %s14_s10 }
   0x3   :  { %s417_s12 = smov 8  }
   0x4   :  { %20 = dma.hbm_to_vmem [thread:$0]  %s13_s8, 2048, %s15_s10, [#allocation3], %s416_s11, %s416_s11, %s417_s12  }
   0x5   :  { %411 = dma.done.wait [#allocation3], 2048  }
   0x6   :  { %412 = vsyncadd [#allocation3], 4294965248  ;;  %v26_v0 = vld [vmem:[#allocation2 + $0x10] sm:$0x1]  ;;  %v34_v1 = vld [vmem:[#allocation2 + $0x11] sm:$0x1] }
   0x7   :  { %v25_v2 = vld [vmem:[#allocation2] sm:$0x1]  ;;  %v441_v3 = vmax.f32 %v26_v0, %v34_v1  ;;  %v33_v4 = vld [vmem:[#allocation2 + $0x1] sm:$0x1]  ;;  %v90_v6 = vld [vmem:[#allocation2 + $0x16] sm:$0x1] }
   0x8   :  { %v443_v5 = vmax.f32 %v25_v2, %v33_v4  ;;  %s418_s13 = smov 127   ;;  %v98_v7 = vld [vmem:[#allocation2 + $0x17] sm:$0x1]  ;;  %v27_v8 = vld [vmem:[#allocation2 + $0x20] sm:$0x1]  ;;  %vm226_vm0 = vcmask 1041409  }
   0x9   :  { %59 = vrot.lane.b32.xlu0 %v441_v3, %s418_s13  ;;  %v35_v9 = vld [vmem:[#allocation2 + $0x21] sm:$0x1]  ;;  %v449_v10 = vmax.f32 %v90_v6, %v98_v7  ;;  %v28_v11 = vld [vmem:[#allocation2 + $0x30] sm:$0x1]  ;;  %v36_v12 = vld [vmem:[#allocation2 + $0x31] sm:$0x1] }
   0xa   :  { %57 = vrot.lane.b32.xlu1 %v443_v5, %s418_s13  ;;  %v453_v13 = vmax.f32 %v27_v8, %v35_v9  ;;  %v29_v14 = vld [vmem:[#allocation2 + $0x40] sm:$0x1]  ;;  %v37_v15 = vld [vmem:[#allocation2 + $0x41] sm:$0x1]  ;;  %v455_v16 = vmax.f32 %v28_v11, %v36_v12  ;;  %v91_v18 = vld [vmem:[#allocation2 + $0x26] sm:$0x1] }
   0xb   :  { %123 = vrot.lane.b32.xlu2 %v449_v10, %s418_s13  ;;  %v457_v17 = vmax.f32 %v29_v14, %v37_v15  ;;  %v99_v19 = vld [vmem:[#allocation2 + $0x27] sm:$0x1]  ;;  %v30_v20 = vld [vmem:[#allocation2 + $0x50] sm:$0x1]  ;;  %v38_v21 = vld [vmem:[#allocation2 + $0x51] sm:$0x1] }
   0xc   :  { %v465_v22 = vmax.f32 %v91_v18, %v99_v19  ;;  %v89_v23 = vld [vmem:[#allocation2 + $0x6] sm:$0x1]  ;;  %v97_v24 = vld [vmem:[#allocation2 + $0x7] sm:$0x1]  ;;  %v467_v25 = vmax.f32 %v30_v20, %v38_v21  ;;  %v92_v27 = vld [vmem:[#allocation2 + $0x36] sm:$0x1] }
   0xd   :  { %v469_v26 = vmax.f32 %v89_v23, %v97_v24  ;;  %v100_v28 = vld [vmem:[#allocation2 + $0x37] sm:$0x1]  ;;  %v31_v29 = vld [vmem:[#allocation2 + $0x60] sm:$0x1]  ;;  %v39_v30 = vld [vmem:[#allocation2 + $0x61] sm:$0x1] }
   0xe   :  { %v477_v31 = vmax.f32 %v92_v27, %v100_v28  ;;  %v93_v32 = vld [vmem:[#allocation2 + $0x46] sm:$0x1]  ;;  %v101_v33 = vld [vmem:[#allocation2 + $0x47] sm:$0x1]  ;;  %v479_v34 = vmax.f32 %v31_v29, %v39_v30  ;;  %v154_v36 = vld [vmem:[#allocation2 + $0x1c] sm:$0x1] }
   0xf   :  { %v481_v35 = vmax.f32 %v93_v32, %v101_v33  ;;  %v162_v37 = vld [vmem:[#allocation2 + $0x1d] sm:$0x1]  ;;  %v32_v38 = vld [vmem:[#allocation2 + $0x70] sm:$0x1]  ;;  %v40_v39 = vld [vmem:[#allocation2 + $0x71] sm:$0x1] }
  0x10   :  { %v489_v40 = vmax.f32 %v154_v36, %v162_v37  ;;  %v94_v41 = vld [vmem:[#allocation2 + $0x56] sm:$0x1]  ;;  %v102_v42 = vld [vmem:[#allocation2 + $0x57] sm:$0x1]  ;;  %v491_v43 = vmax.f32 %v32_v38, %v40_v39  ;;  %v155_v45 = vld [vmem:[#allocation2 + $0x2c] sm:$0x1] }
  0x11   :  { %61 = vrot.lane.b32.xlu0 %v453_v13, %s418_s13  ;;  %v493_v44 = vmax.f32 %v94_v41, %v102_v42  ;;  %v163_v46 = vld [vmem:[#allocation2 + $0x2d] sm:$0x1]  ;;  %v95_v47 = vld [vmem:[#allocation2 + $0x66] sm:$0x1]  ;;  %v103_v48 = vld [vmem:[#allocation2 + $0x67] sm:$0x1] }
  0x12   :  { %63 = vrot.lane.b32.xlu1 %v455_v16, %s418_s13  ;;  %v501_v49 = vmax.f32 %v155_v45, %v163_v46  ;;  %v153_v50 = vld [vmem:[#allocation2 + $0xc] sm:$0x1]  ;;  %v161_v51 = vld [vmem:[#allocation2 + $0xd] sm:$0x1]  ;;  %v503_v52 = vmax.f32 %v95_v47, %v103_v48  ;;  %v156_v54 = vld [vmem:[#allocation2 + $0x3c] sm:$0x1] }
  0x13   :  { %65 = vrot.lane.b32.xlu2 %v457_v17, %s418_s13  ;;  %v505_v53 = vmax.f32 %v153_v50, %v161_v51  ;;  %v164_v55 = vld [vmem:[#allocation2 + $0x3d] sm:$0x1]  ;;  %v96_v56 = vld [vmem:[#allocation2 + $0x76] sm:$0x1]  ;;  %v104_v57 = vld [vmem:[#allocation2 + $0x77] sm:$0x1] }
  0x14   :  { %v513_v58 = vmax.f32 %v156_v54, %v164_v55  ;;  %v157_v59 = vld [vmem:[#allocation2 + $0x4c] sm:$0x1]  ;;  %v165_v60 = vld [vmem:[#allocation2 + $0x4d] sm:$0x1]  ;;  %v515_v61 = vmax.f32 %v96_v56, %v104_v57  ;;  %v158_v63 = vld [vmem:[#allocation2 + $0x5c] sm:$0x1] }
  0x15   :  { %v517_v62 = vmax.f32 %v157_v59, %v165_v60  ;;  %v166_v0 = vld [vmem:[#allocation2 + $0x5d] sm:$0x1]  ;;  %v159_v1 = vld [vmem:[#allocation2 + $0x6c] sm:$0x1]  ;;  %v167_v2 = vld [vmem:[#allocation2 + $0x6d] sm:$0x1] }
  0x16   :  { %v525_v4 = vmax.f32 %v158_v63, %v166_v0  ;;  %v160_v6 = vld [vmem:[#allocation2 + $0x7c] sm:$0x1]  ;;  %v168_v7 = vld [vmem:[#allocation2 + $0x7d] sm:$0x1]  ;;  %v527_v8 = vmax.f32 %v159_v1, %v167_v2  ;;  %vm229_vm1 = vcmask 1042434   ;;  %vm232_vm2 = vcmask 1043459  }
  0x17   :  { %v529_v9 = vmax.f32 %v160_v6, %v168_v7  ;;  %vm235_vm3 = vcmask 1044484   ;;  %vm238_vm4 = vcmask 1045509   ;;  %vm241_vm5 = vcmask 1046534   ;;  %s419_s0 = smov 118   ;;  %s420_s14 = smov 123  }
  0x18   :  { %vm244_vm6 = vcmask 1047559   ;;  %s421_s15 = smov 121   ;;  %s422_s16 = smov 126   ;;  %vm315_vm7 = vcmask 7168   ;;  %vm317_vm8 = vcmask 15360   ;;  %vm319_vm9 = vcmask 23552  }
  0x19   :  { %125 = vrot.lane.b32.xlu0 %v465_v22, %s418_s13  ;;  %s423_s17 = smov 3   ;;  %s424_s18 = smov 124   ;;  %vm321_vm10 = vcmask 31744   ;;  %vm323_vm11 = vcmask 39936   ;;  %vm325_vm12 = vcmask 48128   ;;  %vm327_vm13 = vcmask 56320  }
  0x1a   :  { %67 = vrot.lane.b32.xlu1 %v467_v25, %s418_s13  ;;  %s425_s19 = smov 1   ;;  %s426_s20 = smov 6   ;;  %vm329_vm14 = vcmask 64512   ;;  %vm331_vm15 = vcmask 72704  }
  0x1b   :  { %121 = vrot.lane.b32.xlu2 %v469_v26, %s418_s13  ;;  %s427_s21 = smov [#allocation5]   ;;  %s340_s25 = sshll.u32 %s591_s1, 4  ;;  %s341_s25 = int_to_ptr.hbm [resolvable:$true] %s340_s25 }
  0x1c   :  { %s338_s22 = sshll.u32 %s427_s21, 4  ;;  %s339_s22 = int_to_ptr.vmem [resolvable:$true] %s338_s22 }
  0x21   :  { %127 = vrot.lane.b32.xlu0 %v477_v31, %s418_s13 }
  0x22   :  { %69 = vrot.lane.b32.xlu1 %v479_v34, %s418_s13 }
  0x23   :  { %129 = vrot.lane.b32.xlu2 %v481_v35, %s418_s13 }
  0x29   :  { %187 = vrot.lane.b32.xlu0 %v489_v40, %s418_s13 }
  0x2a   :  { %71 = vrot.lane.b32.xlu1 %v491_v43, %s418_s13 }
  0x2b   :  { %131 = vrot.lane.b32.xlu2 %v493_v44, %s418_s13 }
  0x31   :  { %189 = vrot.lane.b32.xlu0 %v501_v49, %s418_s13 }
  0x32   :  { %133 = vrot.lane.b32.xlu1 %v503_v52, %s418_s13 }
  0x33   :  { %185 = vrot.lane.b32.xlu2 %v505_v53, %s418_s13 }
  0x39   :  { %191 = vrot.lane.b32.xlu0 %v513_v58, %s418_s13 }
  0x3a   :  { %135 = vrot.lane.b32.xlu1 %v515_v61, %s418_s13 }
  0x3b   :  { %193 = vrot.lane.b32.xlu2 %v517_v62, %s418_s13 }
  0x41   :  { %195 = vrot.lane.b32.xlu0 %v525_v4, %s418_s13 }
  0x42   :  { %197 = vrot.lane.b32.xlu1 %v527_v8, %s418_s13 }
  0x43   :  { %199 = vrot.lane.b32.xlu2 %v529_v9, %s418_s13 }
  0x65   :  { %v124_v11 = vpop.permute.xlu2 %123 }
  0x66   :  { %v146_v54 = vmax.f32 %v449_v10, %v124_v11 }
  0x6d   :  { %v66_v12 = vpop.permute.xlu2 %65 }
  0x6e   :  { %v85_v39 = vmax.f32 %v457_v17, %v66_v12 }
  0x70   :  { %v234_v45 = vrot.slane %v85_v39, 4 }
  0x75   :  { %v122_v18 = vpop.permute.xlu2 %121 }
  0x76   :  { %v145_v10 = vmax.f32 %v469_v26, %v122_v18 }
  0x7b   :  { %v60_v14 = vpop.permute.xlu0 %59 }
  0x7c   :  { %v58_v15 = vpop.permute.xlu1 %57  ;;  %v82_v27 = vmax.f32 %v441_v3, %v60_v14 }
  0x7d   :  { %v130_v21 = vpop.permute.xlu2 %129  ;;  %v81_v30 = vmax.f32 %v443_v5, %v58_v15 }
  0x7e   :  { %v225_v29 = vrot.slane %v82_v27, 7 }
  0x80   :  { %v227_v41 = vsel %vm226_vm0, %v225_v29, %v81_v30 }
  0x83   :  { %v62_v19 = vpop.permute.xlu0 %61 }
  0x84   :  { %v64_v20 = vpop.permute.xlu1 %63  ;;  %v83_v28 = vmax.f32 %v453_v13, %v62_v19 }
  0x85   :  { %v84_v32 = vmax.f32 %v455_v16, %v64_v20  ;;  %v132_v36 = vpop.permute.xlu2 %131 }
  0x86   :  { %v228_v37 = vrot.slane %v83_v28, 6  ;;  %v150_v7 = vmax.f32 %v493_v44, %v132_v36 }
  0x87   :  { %v231_v42 = vrot.slane %v84_v32, 5 }
  0x88   :  { %v230_v13 = vsel %vm229_vm1, %v228_v37, %v227_v41  ;;  %v269_v18 = vrot.slane %v150_v7, 3 }
  0x89   :  { %v233_v16 = vsel %vm232_vm2, %v231_v42, %v230_v13 }
  0x8b   :  { %v126_v23 = vpop.permute.xlu0 %125 }
  0x8c   :  { %v68_v24 = vpop.permute.xlu1 %67  ;;  %v147_v56 = vmax.f32 %v465_v22, %v126_v23  ;;  %v149_v22 = vmax.f32 %v481_v35, %v130_v21 }
  0x8d   :  { %v86_v3 = vmax.f32 %v467_v25, %v68_v24  ;;  %v186_v51 = vpop.permute.xlu2 %185  ;;  %v236_v25 = vsel %vm235_vm3, %v234_v45, %v233_v16 }
  0x8e   :  { %v263_v0 = vrot.slane %v147_v56, 6  ;;  %v267_v12 = vrot.slane %v149_v22, 4  ;;  %v209_v28 = vmax.f32 %v505_v53, %v186_v51 }
  0x8f   :  { %v237_v46 = vrot.slane %v86_v3, 3 }
  0x93   :  { %v128_v33 = vpop.permute.xlu0 %127 }
  0x94   :  { %v70_v38 = vpop.permute.xlu1 %69  ;;  %v148_v59 = vmax.f32 %v477_v31, %v128_v33 }
  0x95   :  { %v87_v5 = vmax.f32 %v479_v34, %v70_v38  ;;  %v239_v34 = vsel %vm238_vm4, %v237_v46, %v236_v25  ;;  %v194_v6 = vpop.permute.xlu2 %193 }
  0x96   :  { %v265_v2 = vrot.slane %v148_v59, 5 }
  0x97   :  { %v240_v48 = vrot.slane %v87_v5, 2 }
  0x99   :  { %v242_v57 = vsel %vm241_vm5, %v240_v48, %v239_v34 }
  0x9b   :  { %v188_v47 = vpop.permute.xlu0 %187 }
  0x9c   :  { %v72_v50 = vpop.permute.xlu1 %71  ;;  %v210_v26 = vmax.f32 %v489_v40, %v188_v47  ;;  %v213_v40 = vmax.f32 %v517_v62, %v194_v6 }
  0x9d   :  { %v88_v17 = vmax.f32 %v491_v43, %v72_v50  ;;  %v261_v43 = vrot.slane %v146_v54, 7  ;;  %v200_v32 = vpop.permute.xlu2 %199 }
  0x9e   :  { %v292_v27 = vrot.slane %v210_v26, 7  ;;  %v216_v53 = vmax.f32 %v529_v9, %v200_v32  ;;  %v298_v37 = vrot.slane %v213_v40, 4 }
  0x9f   :  { %v243_v55 = vrot.slane %v88_v17, 1  ;;  %v262_v31 = vsel %vm226_vm0, %v261_v43, %v145_v10 }
  0xa0   :  { %v264_v11 = vsel %vm229_vm1, %v263_v0, %v262_v31  ;;  %v304_v13 = vrot.slane %v216_v53, 1 }
  0xa1   :  { %v555_v60 = vsel %vm244_vm6, %v243_v55, %v242_v57  ;;  %v266_v15 = vsel %vm232_vm2, %v265_v2, %v264_v11 }
  0xa2   :  { %250 = vrot.lane.b32.xlu1 %v555_v60, %s419_s0  ;;  %247 = vrot.lane.b32.xlu0 %v555_v60, %s420_s14  ;;  %v268_v20 = vsel %vm235_vm3, %v267_v12, %v266_v15 }
  0xa3   :  { %v190_v63 = vpop.permute.xlu0 %189 }
  0xa4   :  { %v134_v1 = vpop.permute.xlu1 %133  ;;  %v211_v19 = vmax.f32 %v501_v49, %v190_v63 }
  0xa5   :  { %v151_v14 = vmax.f32 %v503_v52, %v134_v1  ;;  %v270_v52 = vsel %vm238_vm4, %v269_v18, %v268_v20 }
  0xa6   :  { %v294_v29 = vrot.slane %v211_v19, 6 }
  0xa7   :  { %v271_v21 = vrot.slane %v151_v14, 2 }
  0xa9   :  { %v272_v33 = vsel %vm241_vm5, %v271_v21, %v270_v52 }
  0xab   :  { %v192_v35 = vpop.permute.xlu0 %191 }
  0xac   :  { %v212_v23 = vmax.f32 %v513_v58, %v192_v35  ;;  %v136_v24 = vpop.permute.xlu1 %135  ;;  %v293_v58 = vsel %vm226_vm0, %v292_v27, %v209_v28 }
  0xad   :  { %v152_v44 = vmax.f32 %v515_v61, %v136_v24  ;;  %v295_v61 = vsel %vm229_vm1, %v294_v29, %v293_v58 }
  0xae   :  { %v296_v49 = vrot.slane %v212_v23, 5 }
  0xaf   :  { %v273_v30 = vrot.slane %v152_v44, 1 }
  0xb0   :  { %v297_v38 = vsel %vm232_vm2, %v296_v49, %v295_v61 }
  0xb1   :  { %v274_v36 = vsel %vm244_vm6, %v273_v30, %v272_v33  ;;  %v299_v5 = vsel %vm235_vm3, %v298_v37, %v297_v38 }
  0xb2   :  { %281 = vrot.lane.b32.xlu1 %v274_v36, %s421_s15  ;;  %278 = vrot.lane.b32.xlu0 %v274_v36, %s422_s16 }
  0xb3   :  { %275 = vrot.lane.b32.xlu2 %v274_v36, %s423_s17  ;;  %v196_v62 = vpop.permute.xlu0 %195 }
  0xb4   :  { %v214_v39 = vmax.f32 %v525_v4, %v196_v62  ;;  %v198_v41 = vpop.permute.xlu1 %197 }
  0xb5   :  { %v215_v42 = vmax.f32 %v527_v8, %v198_v41 }
  0xb6   :  { %v300_v3 = vrot.slane %v214_v39, 3 }
  0xb7   :  { %v302_v45 = vrot.slane %v215_v42, 2 }
  0xb8   :  { %v301_v9 = vsel %vm238_vm4, %v300_v3, %v299_v5 }
  0xb9   :  { %v303_v16 = vsel %vm241_vm5, %v302_v45, %v301_v9 }
  0xba   :  { %v305_v46 = vsel %vm244_vm6, %v304_v13, %v303_v16 }
  0xbb   :  { %312 = vrot.lane.b32.xlu1 %v305_v46, %s424_s18  ;;  %309 = vrot.lane.b32.xlu0 %v305_v46, %s425_s19 }
  0xbc   :  { %306 = vrot.lane.b32.xlu2 %v305_v46, %s426_s20 }
 0x10d   :  { %v276_v50 = vpop.permute.xlu2 %275 }
 0x114   :  { %v248_v4 = vpop.permute.xlu0 %247  ;;  %v251_v8 = vpop.permute.xlu1 %250 }
 0x115   :  { %v316_v47 = vsel %vm315_vm7, %v555_v60, %v248_v4 }
 0x116   :  { %v318_v48 = vsel %vm317_vm8, %v316_v47, %v251_v8  ;;  %v307_v55 = vpop.permute.xlu2 %306 }
 0x117   :  { %v320_v25 = vsel %vm319_vm9, %v318_v48, %v276_v50 }
 0x124   :  { %v279_v17 = vpop.permute.xlu0 %278  ;;  %v282_v51 = vpop.permute.xlu1 %281 }
 0x125   :  { %v322_v54 = vsel %vm321_vm10, %v320_v25, %v279_v17 }
 0x126   :  { %v324_v34 = vsel %vm323_vm11, %v322_v54, %v282_v51 }
 0x127   :  { %v326_v57 = vsel %vm325_vm12, %v324_v34, %v307_v55 }
 0x12d   :  { %v310_v56 = vpop.permute.xlu0 %309  ;;  %v313_v59 = vpop.permute.xlu1 %312 }
 0x12e   :  { %v328_v60 = vsel %vm327_vm13, %v326_v57, %v310_v56 }
 0x12f   :  { %v330_v43 = vsel %vm329_vm14, %v328_v60, %v313_v59 }
 0x130   :  { %332 = vst.msk [vmem:[#allocation5] sm:$0xff] %vm331_vm15, %v330_v43 }
 0x131   :  { %343 = dma.vmem_to_hbm [thread:$0]  %s339_s22, 128, %s341_s25, [#allocation4]  }
 0x132   :  { %413 = dma.done.wait [#allocation4], 128  }
 0x133   :  { %414 = vsyncadd [#allocation4], 4294967168 }
 0x134   :  { %348 = vsyncpa [#allocation3], 1 }
 0x135   :  { %349 = vsyncpa [#allocation4], 1 }

</bundles_post_ra>
